<compile_context>
chip_gen: v5e
topology: v5e:2x2
jax: 0.10.0
libtpu: 0.0.40
codegen_flags: <defaults>
</compile_context>

<pallas_src>
import math

import jax
import jax.numpy as jnp
from jax.experimental import pallas as pl
from jax.experimental.pallas import tpu as pltpu


def _layernorm(x, w, b, eps=1e-5):
    mu = jnp.mean(x, axis=-1, keepdims=True)
    var = jnp.mean((x - mu) ** 2, axis=-1, keepdims=True)
    return (x - mu) * jax.lax.rsqrt(var + eps) * w + b


def _make_block_kernel(*, fuse_qkv, return_attn, S, S_pad):
    """Kernel factory: one grid step processes a (Bt, S, D) batch tile."""
    f32, bf16 = jnp.float32, jnp.bfloat16

    def kernel(*refs):
        if fuse_qkv:
            (x_ref, ln1w_ref, ln1b_ref, wqkv_ref, wo_ref,
             ln2w_ref, ln2b_ref, w1_ref, b1_ref, w2_ref, b2_ref) = refs[:11]
            rest = refs[11:]
        else:
            (x_ref, ln1w_ref, ln1b_ref, wq_ref, wk_ref, wv_ref, wo_ref,
             ln2w_ref, ln2b_ref, w1_ref, b1_ref, w2_ref, b2_ref) = refs[:13]
            rest = refs[13:]
        out_ref = rest[0]
        attn_ref = rest[1] if return_attn else None

        Bt, S_, D = x_ref.shape
        # Flatten batch*seq so every dense matmul sees M = Bt*S rows (fills
        # the MXU) instead of Bt tiny S-row matmuls.
        x = x_ref[...].astype(f32).reshape(Bt * S_, D)

        # --- self-attention (pre-LN) ---
        h = _layernorm(x, ln1w_ref[...], ln1b_ref[...]).astype(bf16)
        if fuse_qkv:
            # D % 128 == 0: Q/K/V slices are lane-aligned -> free.
            qkv = jnp.dot(h, wqkv_ref[...], preferred_element_type=f32)
            q = qkv[:, 0:D].astype(bf16)
            k = qkv[:, D:2 * D].astype(bf16)
            v = qkv[:, 2 * D:3 * D].astype(bf16)
        else:
            # D < 128 / unaligned: separate matmuls avoid XLU relayout slices.
            q = jnp.dot(h, wq_ref[...], preferred_element_type=f32).astype(bf16)
            k = jnp.dot(h, wk_ref[...], preferred_element_type=f32).astype(bf16)
            v = jnp.dot(h, wv_ref[...], preferred_element_type=f32).astype(bf16)
        q = q.reshape(Bt, S_, D)
        k = k.reshape(Bt, S_, D)
        v = v.reshape(Bt, S_, D)

        scores = jnp.einsum("bqd,bkd->bqk", q, k, preferred_element_type=f32)
        scores = scores * (1.0 / math.sqrt(D))
        scores = scores - jnp.max(scores, axis=-1, keepdims=True)
        p = jnp.exp(scores)
        # approx reciprocal lowers to the EUP slot and co-issues with the exps.
        p = p * pl.reciprocal(jnp.sum(p, axis=-1, keepdims=True), approx=True)

        ctx = jnp.einsum("bqk,bkd->bqd", p.astype(bf16), v,
                         preferred_element_type=f32)
        ctx = ctx.reshape(Bt * S_, D).astype(bf16)
        attn_out = jnp.dot(ctx, wo_ref[...], preferred_element_type=f32)
        x = x + attn_out                                     # residual 1

        # --- MLP (pre-LN) ---
        h2 = _layernorm(x, ln2w_ref[...], ln2b_ref[...]).astype(bf16)
        ff = jnp.dot(h2, w1_ref[...], preferred_element_type=f32) + b1_ref[...]
        ff = jax.nn.gelu(ff, approximate=True).astype(bf16)
        ff = jnp.dot(ff, w2_ref[...], preferred_element_type=f32) + b2_ref[...]
        x = x + ff                                           # residual 2

        out_ref[...] = x.reshape(Bt, S_, D).astype(out_ref.dtype)

        if return_attn:
            if S_pad > S_:
                # Build the lane-dense (multiple-of-128) tile in-register and
                # issue a single dense store (no masked vst.msk / zero store).
                pad = jnp.zeros((Bt, S_, S_pad - S_), f32)
                p = jnp.concatenate([p, pad], axis=-1)
            attn_ref[...] = p.astype(attn_ref.dtype)

    return kernel


def _tpu_vmem_and_cores():
    """Trace-time hardware query with safe fallbacks."""
    vmem = 64 * 1024 * 1024
    try:
        info = pltpu.get_tpu_info()
        vmem = int(getattr(info, "vmem_capacity_bytes", vmem))
    except Exception:
        pass
    # v7x (64 MiB/TC) has 2 TensorCores per chip; v5e/v6e (128 MiB) have 1.
    n_cores = 2 if vmem <= 64 * 1024 * 1024 else 1
    try:
        n_cores = max(n_cores, int(getattr(jax.devices()[0], "num_cores", 1)))
    except Exception:
        pass
    return vmem, n_cores


def _pick_batch_tile(B, S, D, F, S_pad, return_attn, x_itemsize,
                     vmem_limit, weight_bytes, n_cores):
    """VMEM-budget-driven batch tile; keeps grid >= #TensorCores when possible."""
    per_row = (
        2 * S * D * x_itemsize          # x input block (double buffered)
        + 2 * S * D * x_itemsize        # hidden output block (double buffered)
        + 8 * S * D * 4                 # x/h/q/k/v/ctx/attn_out/ff live set
        + 3 * S * max(S_pad, S) * 4     # scores + probs (+ padded copy)
        + 3 * S * F * 4                 # MLP hidden (f32 + bf16 copies)
    )
    if return_attn:
        per_row += 2 * 2 * S * S_pad    # bf16 attn output block (double buffered)
    budget = max(vmem_limit - 2 * weight_bytes, per_row)
    bt = max(1, min(B, budget // per_row))
    if n_cores > 1 and B >= n_cores:
        bt = min(bt, max(1, B // n_cores))   # >= n_cores grid steps (megacore)
    bt = int(bt)
    while B % bt:
        bt -= 1
    return bt


def make_pallas_block(params, *, return_attn=False, batch_tile=None):
    """Returns block(x) -> (hidden_states, attn_probs) or (hidden_states,)."""
    f32, bf16 = jnp.float32, jnp.bfloat16

    D = params["wq"].shape[0]
    F = params["w1"].shape[1]
    fuse_qkv = (D % 128 == 0)

    if fuse_qkv:
        qkv_w = (jnp.concatenate(
            [params["wq"], params["wk"], params["wv"]], axis=1).astype(bf16),)
    else:
        qkv_w = (params["wq"].astype(bf16), params["wk"].astype(bf16),
                 params["wv"].astype(bf16))
    wo = params["wo"].astype(bf16)
    w1 = params["w1"].astype(bf16)
    w2 = params["w2"].astype(bf16)
    ln1w = params["ln1w"].astype(f32)
    ln1b = params["ln1b"].astype(f32)
    ln2w = params["ln2w"].astype(f32)
    ln2b = params["ln2b"].astype(f32)
    b1 = params["b1"].astype(f32)
    b2 = params["b2"].astype(f32)

    weights = (ln1w, ln1b) + qkv_w + (wo, ln2w, ln2b, w1, b1, w2, b2)
    weight_bytes = sum(int(w.size) * w.dtype.itemsize for w in weights)

    vmem_cap, n_cores = _tpu_vmem_and_cores()
    # ~96 MiB on 128 MiB parts (v5e/v6e), ~48 MiB on v7x's 64 MiB part.
    vmem_limit = min(int(vmem_cap * 3 // 4), 112 * 1024 * 1024)
    # Single-buffer the constant weights once their footprint is non-trivial
    # (their index_map never changes, so double-buffering is pure VMEM waste).
    single_buffer_weights = weight_bytes > (2 << 20)

    def block(x):
        B, S, D_ = x.shape
        assert D_ == D
        S_pad = pl.cdiv(S, 128) * 128 if return_attn else S
        if batch_tile is not None:
            Bt = batch_tile
        else:
            Bt = _pick_batch_tile(B, S, D, F, S_pad, return_attn,
                                  x.dtype.itemsize, vmem_limit, weight_bytes,
                                  n_cores)
        assert B % Bt == 0, "batch_tile must divide batch"
        grid = (B // Bt,)

        def wspec(shape):
            nd = len(shape)
            if single_buffer_weights:
                return pl.BlockSpec(shape, lambda b: (0,) * nd,
                                    pipeline_mode=pl.Buffered(1))
            return pl.BlockSpec(shape, lambda b: (0,) * nd)

        in_specs = [pl.BlockSpec((Bt, S, D), lambda b: (b, 0, 0))]   # x
        in_specs += [wspec((1, D)), wspec((1, D))]                   # ln1 w, b
        if fuse_qkv:
            in_specs += [wspec((D, 3 * D))]                          # wqkv
        else:
            in_specs += [wspec((D, D))] * 3                          # wq, wk, wv
        in_specs += [wspec((D, D)),                                  # wo
                     wspec((1, D)), wspec((1, D)),                   # ln2 w, b
                     wspec((D, F)), wspec((1, F)),                   # w1, b1
                     wspec((F, D)), wspec((1, D))]                   # w2, b2
        args = (x,) + weights

        flops = 2 * B * S * (4 * D * D + 2 * S * D + 2 * D * F)
        transcendentals = B * S * (S + F)
        in_bytes = sum(int(a.size) * a.dtype.itemsize for a in args)
        out_bytes = B * S * D * x.dtype.itemsize
        if return_attn:
            out_bytes += B * S * S_pad * 2   # bf16 attn probs
        cost = pl.CostEstimate(flops=flops, transcendentals=transcendentals,
                               bytes_accessed=in_bytes + out_bytes)
        cparams = pltpu.CompilerParams(
            dimension_semantics=("parallel",),
            vmem_limit_bytes=vmem_limit,
        )
        kernel = _make_block_kernel(fuse_qkv=fuse_qkv, return_attn=return_attn,
                                    S=S, S_pad=S_pad)

        if return_attn:
            out_specs = [
                pl.BlockSpec((Bt, S, D), lambda b: (b, 0, 0)),
                pl.BlockSpec((Bt, S, S_pad), lambda b: (b, 0, 0)),
            ]
            out_shape = [
                jax.ShapeDtypeStruct((B, S, D), x.dtype),
                jax.ShapeDtypeStruct((B, S, S_pad), jnp.bfloat16),
            ]
            hidden, attn_pad = pl.pallas_call(
                kernel, grid=grid,
                in_specs=in_specs, out_specs=out_specs, out_shape=out_shape,
                compiler_params=cparams, cost_estimate=cost,
            )(*args)
            attn = attn_pad[:, :, :S] if S_pad != S else attn_pad
            return hidden, attn

        hidden = pl.pallas_call(
            kernel, grid=grid,
            in_specs=in_specs,
            out_specs=pl.BlockSpec((Bt, S, D), lambda b: (b, 0, 0)),
            out_shape=jax.ShapeDtypeStruct((B, S, D), x.dtype),
            compiler_params=cparams, cost_estimate=cost,
        )(*args)
        return (hidden,)

    return jax.jit(block)


class BlockOutputWrapper:
    """JAX port of the PyTorch BlockOutputWrapper: captures output[0]."""

    def __init__(self, block):
        self.block = block
        self.block_output = None

    def __call__(self, *args, **kwargs):
        output = self.block(*args, **kwargs)
        self.block_output = output[0]
        return output


def _reference_block(x, params):
    """Pure-JAX f32 reference of the wrapped block."""
    x = x.astype(jnp.float32)
    h = _layernorm(x, params["ln1w"], params["ln1b"])
    q = h @ params["wq"]
    k = h @ params["wk"]
    v = h @ params["wv"]
    scores = (q @ jnp.swapaxes(k, -1, -2)) / math.sqrt(x.shape[-1])
    p = jax.nn.softmax(scores, axis=-1)
    attn = (p @ v) @ params["wo"]
    x = x + attn
    h2 = _layernorm(x, params["ln2w"], params["ln2b"])
    ff = jax.nn.gelu(h2 @ params["w1"] + params["b1"], approximate=True)
    ff = ff @ params["w2"] + params["b2"]
    return x + ff, p


def init_params(key, D, F):
    ks = jax.random.split(key, 6)
    scale = 0.02
    return {
        "ln1w": jnp.ones((1, D), jnp.float32),
        "ln1b": jnp.zeros((1, D), jnp.float32),
        "wq": scale * jax.random.normal(ks[0], (D, D), jnp.float32),
        "wk": scale * jax.random.normal(ks[1], (D, D), jnp.float32),
        "wv": scale * jax.random.normal(ks[2], (D, D), jnp.float32),
        "wo": scale * jax.random.normal(ks[3], (D, D), jnp.float32),
        "ln2w": jnp.ones((1, D), jnp.float32),
        "ln2b": jnp.zeros((1, D), jnp.float32),
        "w1": scale * jax.random.normal(ks[4], (D, F), jnp.float32),
        "b1": jnp.zeros((1, F), jnp.float32),
        "w2": scale * jax.random.normal(ks[5], (F, D), jnp.float32),
        "b2": jnp.zeros((1, D), jnp.float32),
    }


if __name__ == "__main__":
    B, S, D, F = 2, 8, 32, 128

    key = jax.random.PRNGKey(0)
    kx, kp = jax.random.split(key)
    x = jax.random.normal(kx, (B, S, D), jnp.float32)
    params = init_params(kp, D, F)

    ref_hidden, ref_attn = _reference_block(x, params)

    # Full HF-style block output (hidden, attn) — attn emitted lane-dense bf16.
    block = make_pallas_block(params, return_attn=True)
    wrapped = BlockOutputWrapper(block)
    out = wrapped(x)
    hidden, attn = out[0], out[1]
    jax.block_until_ready(hidden)
    jax.block_until_ready(attn)

    # bf16 MXU operands + bf16 attn output + approx reciprocal => loose tol.
    assert jnp.allclose(hidden, ref_hidden, atol=2e-2, rtol=2e-2)
    assert jnp.allclose(attn.astype(jnp.float32), ref_attn, atol=2e-2, rtol=2e-2)
    assert wrapped.block_output is hidden      # wrapper captured output[0]

    # Default fast path: skip the (B,S,S) attn writeback entirely (wrapper only
    # keeps output[0]); still returns a tuple so indexing semantics hold.
    block_fast = make_pallas_block(params, return_attn=False)
    wrapped_fast = BlockOutputWrapper(block_fast)
    out_fast = wrapped_fast(x)
    jax.block_until_ready(out_fast[0])
    assert jnp.allclose(out_fast[0], ref_hidden, atol=2e-2, rtol=2e-2)
    assert wrapped_fast.block_output is out_fast[0]

    print("KERNEL_OK")
</pallas_src>

<mosaic_0001>
module attributes {stable_mosaic.version = 11 : i64} {
  func.func @kernel(%arg0: i32, %arg1: memref<1x8x32xf32, #tpu.memory_space<vmem>>, %arg2: memref<1x32xf32, #tpu.memory_space<vmem>>, %arg3: memref<1x32xf32, #tpu.memory_space<vmem>>, %arg4: memref<32x32xbf16, #tpu.memory_space<vmem>>, %arg5: memref<32x32xbf16, #tpu.memory_space<vmem>>, %arg6: memref<32x32xbf16, #tpu.memory_space<vmem>>, %arg7: memref<32x32xbf16, #tpu.memory_space<vmem>>, %arg8: memref<1x32xf32, #tpu.memory_space<vmem>>, %arg9: memref<1x32xf32, #tpu.memory_space<vmem>>, %arg10: memref<32x128xbf16, #tpu.memory_space<vmem>>, %arg11: memref<1x128xf32, #tpu.memory_space<vmem>>, %arg12: memref<128x32xbf16, #tpu.memory_space<vmem>>, %arg13: memref<1x32xf32, #tpu.memory_space<vmem>>, %arg14: memref<1x8x32xf32, #tpu.memory_space<vmem>>, %arg15: memref<1x8x128xbf16, #tpu.memory_space<vmem>>) attributes {dimension_semantics = [#tpu.dimension_semantics<parallel>], iteration_bounds = array<i64: 2>, scalar_prefetch = 0 : i64, scratch_operands = 0 : i64, tpu.core_type = #tpu.core_type<tc>, window_params = [{transform_indices = @transform_0, window_bounds = array<i64: 1, 8, 32>}, {pipeline_mode = #tpu.pipeline_mode<synchronous>, transform_indices = @transform_1, window_bounds = array<i64: 1, 32>}, {pipeline_mode = #tpu.pipeline_mode<synchronous>, transform_indices = @transform_2, window_bounds = array<i64: 1, 32>}, {pipeline_mode = #tpu.pipeline_mode<synchronous>, transform_indices = @transform_3, window_bounds = array<i64: 32, 32>}, {pipeline_mode = #tpu.pipeline_mode<synchronous>, transform_indices = @transform_4, window_bounds = array<i64: 32, 32>}, {pipeline_mode = #tpu.pipeline_mode<synchronous>, transform_indices = @transform_5, window_bounds = array<i64: 32, 32>}, {pipeline_mode = #tpu.pipeline_mode<synchronous>, transform_indices = @transform_6, window_bounds = array<i64: 32, 32>}, {pipeline_mode = #tpu.pipeline_mode<synchronous>, transform_indices = @transform_7, window_bounds = array<i64: 1, 32>}, {pipeline_mode = #tpu.pipeline_mode<synchronous>, transform_indices = @transform_8, window_bounds = array<i64: 1, 32>}, {pipeline_mode = #tpu.pipeline_mode<synchronous>, transform_indices = @transform_9, window_bounds = array<i64: 32, 128>}, {pipeline_mode = #tpu.pipeline_mode<synchronous>, transform_indices = @transform_10, window_bounds = array<i64: 1, 128>}, {pipeline_mode = #tpu.pipeline_mode<synchronous>, transform_indices = @transform_11, window_bounds = array<i64: 128, 32>}, {pipeline_mode = #tpu.pipeline_mode<synchronous>, transform_indices = @transform_12, window_bounds = array<i64: 1, 32>}, {transform_indices = @transform_13, window_bounds = array<i64: 1, 8, 32>}, {transform_indices = @transform_14, window_bounds = array<i64: 1, 8, 128>}]} {
    %c0 = arith.constant 0 : index
    %c0_0 = arith.constant 0 : index
    %c0_1 = arith.constant 0 : index
    %0 = vector.load %arg1[%c0, %c0_0, %c0_1] : memref<1x8x32xf32, #tpu.memory_space<vmem>>, vector<1x8x32xf32>
    %1 = vector.shape_cast %0 : vector<1x8x32xf32> to vector<8x32xf32>
    %c0_2 = arith.constant 0 : index
    %c0_3 = arith.constant 0 : index
    %2 = vector.load %arg2[%c0_2, %c0_3] : memref<1x32xf32, #tpu.memory_space<vmem>>, vector<1x32xf32>
    %c0_4 = arith.constant 0 : index
    %c0_5 = arith.constant 0 : index
    %3 = vector.load %arg3[%c0_4, %c0_5] : memref<1x32xf32, #tpu.memory_space<vmem>>, vector<1x32xf32>
    %cst = arith.constant dense<0.000000e+00> : vector<8xf32>
    %4 = vector.multi_reduction <add>, %1, %cst [1] : vector<8x32xf32> to vector<8xf32>
    %5 = vector.shape_cast %4 : vector<8xf32> to vector<8x1xf32>
    %cst_6 = arith.constant 3.200000e+01 : f32
    %6 = vector.broadcast %cst_6 : f32 to vector<8x1xf32>
    %7 = arith.divf %5, %6 : vector<8x1xf32>
    %8 = vector.broadcast %7 : vector<8x1xf32> to vector<8x32xf32>
    %9 = arith.subf %1, %8 : vector<8x32xf32>
    %10 = arith.mulf %9, %9 : vector<8x32xf32>
    %cst_7 = arith.constant dense<0.000000e+00> : vector<8xf32>
    %11 = vector.multi_reduction <add>, %10, %cst_7 [1] : vector<8x32xf32> to vector<8xf32>
    %12 = vector.shape_cast %11 : vector<8xf32> to vector<8x1xf32>
    %cst_8 = arith.constant 3.200000e+01 : f32
    %13 = vector.broadcast %cst_8 : f32 to vector<8x1xf32>
    %14 = arith.divf %12, %13 : vector<8x1xf32>
    %15 = vector.broadcast %7 : vector<8x1xf32> to vector<8x32xf32>
    %16 = arith.subf %1, %15 : vector<8x32xf32>
    %cst_9 = arith.constant 9.99999974E-6 : f32
    %17 = vector.broadcast %cst_9 : f32 to vector<8x1xf32>
    %18 = arith.addf %14, %17 : vector<8x1xf32>
    %19 = math.rsqrt %18 : vector<8x1xf32>
    %20 = vector.broadcast %19 : vector<8x1xf32> to vector<8x32xf32>
    %21 = arith.mulf %16, %20 : vector<8x32xf32>
    %22 = vector.broadcast %2 : vector<1x32xf32> to vector<8x32xf32>
    %23 = arith.mulf %21, %22 : vector<8x32xf32>
    %24 = vector.broadcast %3 : vector<1x32xf32> to vector<8x32xf32>
    %25 = arith.addf %23, %24 : vector<8x32xf32>
    %26 = arith.truncf %25 : vector<8x32xf32> to vector<8x32xbf16>
    %c0_10 = arith.constant 0 : index
    %c0_11 = arith.constant 0 : index
    %27 = vector.load %arg4[%c0_10, %c0_11] : memref<32x32xbf16, #tpu.memory_space<vmem>>, vector<32x32xbf16>
    %cst_12 = arith.constant dense<0.000000e+00> : vector<8x32xf32>
    %28 = tpu.matmul %26, %27, %cst_12 {dimension_numbers = #tpu.dot_dimension_numbers<[1], [0], [0], [1], [0, 0, 1, 1], [], []>} : vector<8x32xbf16>, vector<32x32xbf16>, vector<8x32xf32> -> vector<8x32xf32>
    %29 = arith.truncf %28 : vector<8x32xf32> to vector<8x32xbf16>
    %c0_13 = arith.constant 0 : index
    %c0_14 = arith.constant 0 : index
    %30 = vector.load %arg5[%c0_13, %c0_14] : memref<32x32xbf16, #tpu.memory_space<vmem>>, vector<32x32xbf16>
    %cst_15 = arith.constant dense<0.000000e+00> : vector<8x32xf32>
    %31 = tpu.matmul %26, %30, %cst_15 {dimension_numbers = #tpu.dot_dimension_numbers<[1], [0], [0], [1], [0, 0, 1, 1], [], []>} : vector<8x32xbf16>, vector<32x32xbf16>, vector<8x32xf32> -> vector<8x32xf32>
    %32 = arith.truncf %31 : vector<8x32xf32> to vector<8x32xbf16>
    %c0_16 = arith.constant 0 : index
    %c0_17 = arith.constant 0 : index
    %33 = vector.load %arg6[%c0_16, %c0_17] : memref<32x32xbf16, #tpu.memory_space<vmem>>, vector<32x32xbf16>
    %cst_18 = arith.constant dense<0.000000e+00> : vector<8x32xf32>
    %34 = tpu.matmul %26, %33, %cst_18 {dimension_numbers = #tpu.dot_dimension_numbers<[1], [0], [0], [1], [0, 0, 1, 1], [], []>} : vector<8x32xbf16>, vector<32x32xbf16>, vector<8x32xf32> -> vector<8x32xf32>
    %35 = arith.truncf %34 : vector<8x32xf32> to vector<8x32xbf16>
    %36 = vector.shape_cast %29 : vector<8x32xbf16> to vector<1x8x32xbf16>
    %37 = vector.shape_cast %32 : vector<8x32xbf16> to vector<1x8x32xbf16>
    %38 = vector.shape_cast %35 : vector<8x32xbf16> to vector<1x8x32xbf16>
    "tpu.trace_start"() <{level = 10 : i32, message = "bqd,bkd->bqk"}> : () -> ()
    %cst_19 = arith.constant dense<0.000000e+00> : vector<1x8x8xf32>
    %39 = tpu.matmul %36, %37, %cst_19 {dimension_numbers = #tpu.dot_dimension_numbers<[2], [2], [1], [1], [0, 0, 0, 1, 1, 1], [0], [0]>} : vector<1x8x32xbf16>, vector<1x8x32xbf16>, vector<1x8x8xf32> -> vector<1x8x8xf32>
    "tpu.trace_stop"() : () -> ()
    %cst_20 = arith.constant 0.176776692 : f32
    %40 = vector.broadcast %cst_20 : f32 to vector<1x8x8xf32>
    %41 = arith.mulf %39, %40 : vector<1x8x8xf32>
    %cst_21 = arith.constant dense<0xFF800000> : vector<1x8xf32>
    %42 = vector.multi_reduction <maximumf>, %41, %cst_21 [2] : vector<1x8x8xf32> to vector<1x8xf32>
    %43 = vector.shape_cast %42 : vector<1x8xf32> to vector<1x8x1xf32>
    %44 = vector.broadcast %43 : vector<1x8x1xf32> to vector<1x8x8xf32>
    %45 = arith.subf %41, %44 : vector<1x8x8xf32>
    %46 = math.exp %45 : vector<1x8x8xf32>
    %cst_22 = arith.constant dense<0.000000e+00> : vector<1x8xf32>
    %47 = vector.multi_reduction <add>, %46, %cst_22 [2] : vector<1x8x8xf32> to vector<1x8xf32>
    %48 = vector.shape_cast %47 : vector<1x8xf32> to vector<1x8x1xf32>
    %49 = tpu.reciprocal %48 {approx = true} : vector<1x8x1xf32> -> vector<1x8x1xf32>
    %50 = vector.broadcast %49 : vector<1x8x1xf32> to vector<1x8x8xf32>
    %51 = arith.mulf %46, %50 : vector<1x8x8xf32>
    %52 = arith.truncf %51 : vector<1x8x8xf32> to vector<1x8x8xbf16>
    "tpu.trace_start"() <{level = 10 : i32, message = "bqk,bkd->bqd"}> : () -> ()
    %cst_23 = arith.constant dense<0.000000e+00> : vector<1x8x32xf32>
    %53 = tpu.matmul %52, %38, %cst_23 {dimension_numbers = #tpu.dot_dimension_numbers<[2], [1], [1], [2], [0, 0, 0, 1, 1, 2], [0], [0]>} : vector<1x8x8xbf16>, vector<1x8x32xbf16>, vector<1x8x32xf32> -> vector<1x8x32xf32>
    "tpu.trace_stop"() : () -> ()
    %54 = vector.shape_cast %53 : vector<1x8x32xf32> to vector<8x32xf32>
    %55 = arith.truncf %54 : vector<8x32xf32> to vector<8x32xbf16>
    %c0_24 = arith.constant 0 : index
    %c0_25 = arith.constant 0 : index
    %56 = vector.load %arg7[%c0_24, %c0_25] : memref<32x32xbf16, #tpu.memory_space<vmem>>, vector<32x32xbf16>
    %cst_26 = arith.constant dense<0.000000e+00> : vector<8x32xf32>
    %57 = tpu.matmul %55, %56, %cst_26 {dimension_numbers = #tpu.dot_dimension_numbers<[1], [0], [0], [1], [0, 0, 1, 1], [], []>} : vector<8x32xbf16>, vector<32x32xbf16>, vector<8x32xf32> -> vector<8x32xf32>
    %58 = arith.addf %1, %57 : vector<8x32xf32>
    %c0_27 = arith.constant 0 : index
    %c0_28 = arith.constant 0 : index
    %59 = vector.load %arg8[%c0_27, %c0_28] : memref<1x32xf32, #tpu.memory_space<vmem>>, vector<1x32xf32>
    %c0_29 = arith.constant 0 : index
    %c0_30 = arith.constant 0 : index
    %60 = vector.load %arg9[%c0_29, %c0_30] : memref<1x32xf32, #tpu.memory_space<vmem>>, vector<1x32xf32>
    %cst_31 = arith.constant dense<0.000000e+00> : vector<8xf32>
    %61 = vector.multi_reduction <add>, %58, %cst_31 [1] : vector<8x32xf32> to vector<8xf32>
    %62 = vector.shape_cast %61 : vector<8xf32> to vector<8x1xf32>
    %cst_32 = arith.constant 3.200000e+01 : f32
    %63 = vector.broadcast %cst_32 : f32 to vector<8x1xf32>
    %64 = arith.divf %62, %63 : vector<8x1xf32>
    %65 = vector.broadcast %64 : vector<8x1xf32> to vector<8x32xf32>
    %66 = arith.subf %58, %65 : vector<8x32xf32>
    %67 = arith.mulf %66, %66 : vector<8x32xf32>
    %cst_33 = arith.constant dense<0.000000e+00> : vector<8xf32>
    %68 = vector.multi_reduction <add>, %67, %cst_33 [1] : vector<8x32xf32> to vector<8xf32>
    %69 = vector.shape_cast %68 : vector<8xf32> to vector<8x1xf32>
    %cst_34 = arith.constant 3.200000e+01 : f32
    %70 = vector.broadcast %cst_34 : f32 to vector<8x1xf32>
    %71 = arith.divf %69, %70 : vector<8x1xf32>
    %72 = vector.broadcast %64 : vector<8x1xf32> to vector<8x32xf32>
    %73 = arith.subf %58, %72 : vector<8x32xf32>
    %cst_35 = arith.constant 9.99999974E-6 : f32
    %74 = vector.broadcast %cst_35 : f32 to vector<8x1xf32>
    %75 = arith.addf %71, %74 : vector<8x1xf32>
    %76 = math.rsqrt %75 : vector<8x1xf32>
    %77 = vector.broadcast %76 : vector<8x1xf32> to vector<8x32xf32>
    %78 = arith.mulf %73, %77 : vector<8x32xf32>
    %79 = vector.broadcast %59 : vector<1x32xf32> to vector<8x32xf32>
    %80 = arith.mulf %78, %79 : vector<8x32xf32>
    %81 = vector.broadcast %60 : vector<1x32xf32> to vector<8x32xf32>
    %82 = arith.addf %80, %81 : vector<8x32xf32>
    %83 = arith.truncf %82 : vector<8x32xf32> to vector<8x32xbf16>
    %c0_36 = arith.constant 0 : index
    %c0_37 = arith.constant 0 : index
    %84 = vector.load %arg10[%c0_36, %c0_37] : memref<32x128xbf16, #tpu.memory_space<vmem>>, vector<32x128xbf16>
    %cst_38 = arith.constant dense<0.000000e+00> : vector<8x128xf32>
    %85 = tpu.matmul %83, %84, %cst_38 {dimension_numbers = #tpu.dot_dimension_numbers<[1], [0], [0], [1], [0, 0, 1, 1], [], []>} : vector<8x32xbf16>, vector<32x128xbf16>, vector<8x128xf32> -> vector<8x128xf32>
    %c0_39 = arith.constant 0 : index
    %c0_40 = arith.constant 0 : index
    %86 = vector.load %arg11[%c0_39, %c0_40] : memref<1x128xf32, #tpu.memory_space<vmem>>, vector<1x128xf32>
    %87 = vector.broadcast %86 : vector<1x128xf32> to vector<8x128xf32>
    %88 = arith.addf %85, %87 : vector<8x128xf32>
    %89 = arith.mulf %88, %88 : vector<8x128xf32>
    %90 = arith.mulf %88, %89 : vector<8x128xf32>
    %cst_41 = arith.constant 4.471500e-02 : f32
    %91 = vector.broadcast %cst_41 : f32 to vector<8x128xf32>
    %92 = arith.mulf %91, %90 : vector<8x128xf32>
    %93 = arith.addf %88, %92 : vector<8x128xf32>
    %cst_42 = arith.constant 0.797884583 : f32
    %94 = vector.broadcast %cst_42 : f32 to vector<8x128xf32>
    %95 = arith.mulf %94, %93 : vector<8x128xf32>
    %96 = math.tanh %95 : vector<8x128xf32>
    %cst_43 = arith.constant 1.000000e+00 : f32
    %97 = vector.broadcast %cst_43 : f32 to vector<8x128xf32>
    %98 = arith.addf %97, %96 : vector<8x128xf32>
    %cst_44 = arith.constant 5.000000e-01 : f32
    %99 = vector.broadcast %cst_44 : f32 to vector<8x128xf32>
    %100 = arith.mulf %99, %98 : vector<8x128xf32>
    %101 = arith.mulf %88, %100 : vector<8x128xf32>
    %102 = arith.truncf %101 : vector<8x128xf32> to vector<8x128xbf16>
    %c0_45 = arith.constant 0 : index
    %c0_46 = arith.constant 0 : index
    %103 = vector.load %arg12[%c0_45, %c0_46] : memref<128x32xbf16, #tpu.memory_space<vmem>>, vector<128x32xbf16>
    %cst_47 = arith.constant dense<0.000000e+00> : vector<8x32xf32>
    %104 = tpu.matmul %102, %103, %cst_47 {dimension_numbers = #tpu.dot_dimension_numbers<[1], [0], [0], [1], [0, 0, 1, 1], [], []>} : vector<8x128xbf16>, vector<128x32xbf16>, vector<8x32xf32> -> vector<8x32xf32>
    %c0_48 = arith.constant 0 : index
    %c0_49 = arith.constant 0 : index
    %105 = vector.load %arg13[%c0_48, %c0_49] : memref<1x32xf32, #tpu.memory_space<vmem>>, vector<1x32xf32>
    %106 = vector.broadcast %105 : vector<1x32xf32> to vector<8x32xf32>
    %107 = arith.addf %104, %106 : vector<8x32xf32>
    %108 = arith.addf %58, %107 : vector<8x32xf32>
    %109 = vector.shape_cast %108 : vector<8x32xf32> to vector<1x8x32xf32>
    %c0_50 = arith.constant 0 : index
    %c0_51 = arith.constant 0 : index
    %c0_52 = arith.constant 0 : index
    %110 = vector.load %arg14[%c0_50, %c0_51, %c0_52] : memref<1x8x32xf32, #tpu.memory_space<vmem>>, vector<1x8x32xf32>
    tpu.vector_store %arg14[%c0_50, %c0_51, %c0_52], %109 {strides = array<i32>} : memref<1x8x32xf32, #tpu.memory_space<vmem>>, vector<1x8x32xf32>,
    %cst_53 = arith.constant 0.000000e+00 : f32
    %111 = vector.broadcast %cst_53 : f32 to vector<1x8x120xf32>
    %112 = tpu.concatenate %51, %111 in 2 : vector<1x8x8xf32>, vector<1x8x120xf32> -> vector<1x8x128xf32>
    %113 = arith.truncf %112 : vector<1x8x128xf32> to vector<1x8x128xbf16>
    %c0_54 = arith.constant 0 : index
    %c0_55 = arith.constant 0 : index
    %c0_56 = arith.constant 0 : index
    %114 = vector.load %arg15[%c0_54, %c0_55, %c0_56] : memref<1x8x128xbf16, #tpu.memory_space<vmem>>, vector<1x8x128xbf16>
    tpu.vector_store %arg15[%c0_54, %c0_55, %c0_56], %113 {strides = array<i32>} : memref<1x8x128xbf16, #tpu.memory_space<vmem>>, vector<1x8x128xbf16>,
    return
  }
  func.func @transform_0(%arg0: i32) -> (i32, i32, i32) {
    %c0_i32 = arith.constant 0 : i32
    %c0_i32_0 = arith.constant 0 : i32
    %c0_i32_1 = arith.constant 0 : i32
    return %arg0, %c0_i32, %c0_i32_0 : i32, i32, i32
  }
  func.func @transform_1(%arg0: i32) -> (i32, i32) {
    %c0_i32 = arith.constant 0 : i32
    %c0_i32_0 = arith.constant 0 : i32
    %c0_i32_1 = arith.constant 0 : i32
    return %c0_i32, %c0_i32_0 : i32, i32
  }
  func.func @transform_2(%arg0: i32) -> (i32, i32) {
    %c0_i32 = arith.constant 0 : i32
    %c0_i32_0 = arith.constant 0 : i32
    %c0_i32_1 = arith.constant 0 : i32
    return %c0_i32, %c0_i32_0 : i32, i32
  }
  func.func @transform_3(%arg0: i32) -> (i32, i32) {
    %c0_i32 = arith.constant 0 : i32
    %c0_i32_0 = arith.constant 0 : i32
    %c0_i32_1 = arith.constant 0 : i32
    return %c0_i32, %c0_i32_0 : i32, i32
  }
  func.func @transform_4(%arg0: i32) -> (i32, i32) {
    %c0_i32 = arith.constant 0 : i32
    %c0_i32_0 = arith.constant 0 : i32
    %c0_i32_1 = arith.constant 0 : i32
    return %c0_i32, %c0_i32_0 : i32, i32
  }
  func.func @transform_5(%arg0: i32) -> (i32, i32) {
    %c0_i32 = arith.constant 0 : i32
    %c0_i32_0 = arith.constant 0 : i32
    %c0_i32_1 = arith.constant 0 : i32
    return %c0_i32, %c0_i32_0 : i32, i32
  }
  func.func @transform_6(%arg0: i32) -> (i32, i32) {
    %c0_i32 = arith.constant 0 : i32
    %c0_i32_0 = arith.constant 0 : i32
    %c0_i32_1 = arith.constant 0 : i32
    return %c0_i32, %c0_i32_0 : i32, i32
  }
  func.func @transform_7(%arg0: i32) -> (i32, i32) {
    %c0_i32 = arith.constant 0 : i32
    %c0_i32_0 = arith.constant 0 : i32
    %c0_i32_1 = arith.constant 0 : i32
    return %c0_i32, %c0_i32_0 : i32, i32
  }
  func.func @transform_8(%arg0: i32) -> (i32, i32) {
    %c0_i32 = arith.constant 0 : i32
    %c0_i32_0 = arith.constant 0 : i32
    %c0_i32_1 = arith.constant 0 : i32
    return %c0_i32, %c0_i32_0 : i32, i32
  }
  func.func @transform_9(%arg0: i32) -> (i32, i32) {
    %c0_i32 = arith.constant 0 : i32
    %c0_i32_0 = arith.constant 0 : i32
    %c0_i32_1 = arith.constant 0 : i32
    return %c0_i32, %c0_i32_0 : i32, i32
  }
  func.func @transform_10(%arg0: i32) -> (i32, i32) {
    %c0_i32 = arith.constant 0 : i32
    %c0_i32_0 = arith.constant 0 : i32
    %c0_i32_1 = arith.constant 0 : i32
    return %c0_i32, %c0_i32_0 : i32, i32
  }
  func.func @transform_11(%arg0: i32) -> (i32, i32) {
    %c0_i32 = arith.constant 0 : i32
    %c0_i32_0 = arith.constant 0 : i32
    %c0_i32_1 = arith.constant 0 : i32
    return %c0_i32, %c0_i32_0 : i32, i32
  }
  func.func @transform_12(%arg0: i32) -> (i32, i32) {
    %c0_i32 = arith.constant 0 : i32
    %c0_i32_0 = arith.constant 0 : i32
    %c0_i32_1 = arith.constant 0 : i32
    return %c0_i32, %c0_i32_0 : i32, i32
  }
  func.func @transform_13(%arg0: i32) -> (i32, i32, i32) {
    %c0_i32 = arith.constant 0 : i32
    %c0_i32_0 = arith.constant 0 : i32
    %c0_i32_1 = arith.constant 0 : i32
    return %arg0, %c0_i32, %c0_i32_0 : i32, i32, i32
  }
  func.func @transform_14(%arg0: i32) -> (i32, i32, i32) {
    %c0_i32 = arith.constant 0 : i32
    %c0_i32_0 = arith.constant 0 : i32
    %c0_i32_1 = arith.constant 0 : i32
    return %arg0, %c0_i32, %c0_i32_0 : i32, i32, i32
  }
}

</mosaic_0001>

<bundles_post_ra>
// kernel: block.1
= control target key start
LH: loop header
LB: loop body
LE: loop exit
PB: predicated region body
PF: predicated region fallthrough
CT: control target
= control target key end

     0   :  { %s2114_s0 = inlined_call_operand.hbm [shape: f32[2,8,32], index: 0, kind: input, shape index: {}]   ;;  %s2115_s1 = inlined_call_operand.vmem [shape: f32[1,32], index: 1, kind: input, shape index: {}, may-alias: {1,7}]   ;;  %s2116_s2 = inlined_call_operand.vmem [shape: f32[1,32], index: 2, kind: input, shape index: {}, may-alias: {2,8,12}]   ;;  %s2117_s3 = inlined_call_operand.hbm [shape: bf16[32,32], index: 3, kind: input, shape index: {}]   ;;  %s2118_s4 = inlined_call_operand.hbm [shape: bf16[32,32], index: 4, kind: input, shape index: {}]   ;;  %s2119_s5 = inlined_call_operand.hbm [shape: bf16[32,32], index: 5, kind: input, shape index: {}]   ;;  %s2120_s6 = inlined_call_operand.hbm [shape: bf16[32,32], index: 6, kind: input, shape index: {}]   ;;  %s2121_s7 = inlined_call_operand.vmem [shape: f32[1,32], index: 7, kind: input, shape index: {}, may-alias: {1,7}]   ;;  %s2122_s8 = inlined_call_operand.vmem [shape: f32[1,32], index: 8, kind: input, shape index: {}, may-alias: {2,8,12}]   ;;  %s2123_s9 = inlined_call_operand.hbm [shape: bf16[32,128], index: 9, kind: input, shape index: {}]   ;;  %s2124_s10 = inlined_call_operand.vmem [shape: f32[1,128], index: 10, kind: input, shape index: {}]   ;;  %s2125_s11 = inlined_call_operand.hbm [shape: bf16[128,32], index: 11, kind: input, shape index: {}]   ;;  %s2126_s12 = inlined_call_operand.vmem [shape: f32[1,32], index: 12, kind: input, shape index: {}, may-alias: {2,8,12}]   ;;  %s2127_s13 = inlined_call_operand.hbm [shape: f32[2,8,32], index: 13, kind: output, shape index: {0}]   ;;  %s2128_s14 = inlined_call_operand.hbm [shape: bf16[2,8,128], index: 14, kind: output, shape index: {1}]  }
   0x1   :  { %2131 = sst [smem:[#allocation24_spill]] %s2117_s3 }
   0x2   :  { %2132 = sst [smem:[#allocation25_spill]] %s2118_s4 }
   0x3   :  { %2133 = sst [smem:[#allocation26_spill]] %s2119_s5 }
   0x4   :  { %2134 = sst [smem:[#allocation27_spill]] %s2120_s6 }
   0x5   :  { %2135 = sst [smem:[#allocation28_spill]] %s2123_s9 }
   0x6   :  { %2136 = sst [smem:[#allocation29_spill]] %s2125_s11 }
   0x7   :  { %2137 = sst [smem:[#allocation30_spill]] %s2126_s12 }
   0x8   :  { %2138 = sst [smem:[#allocation31_spill]] %s2127_s13 }
   0x9   :  { %20 = vsyncpa [#allocation3], 0 }
   0xa   :  { %22 = vsyncpa [#allocation3 + $0x1], 0 }
   0xb   :  { %23 = vsyncpa [#allocation6], 0 }
   0xc   :  { %24 = vsyncpa [#allocation9], 0 }
   0xd   :  { %25 = vsyncpa [#allocation12], 0 }
   0xe   :  { %26 = vsyncpa [#allocation4], 0 }
   0xf   :  { %28 = vsyncpa [#allocation4 + $0x1], 0 }
  0x10   :  { %29 = vsyncpa [#allocation16], 0 }
  0x11   :  { %31 = vsyncpa [#allocation16 + $0x1], 0  ;;  %s1841_s29 = smov 0   ;;  %s1843_s30 = smov 0  }
  0x12   :  { %s1845_s15 = smov 0   ;;  %s1847_s16 = smov 0  }
  0x13 LB: > { %s2139_s3 = sld [smem:[#allocation24_spill]]  ;;  %s1865_s20 = sadd.s32 4294967295, %s1755_s16   ;;  %s1755_s16 = sphi %s1847_s16, %s2161_s16   ;;  %s1751_s15 = sphi %s1845_s15, %s2160_s15   ;;  %s1747_s30 = sphi %s1843_s30, %s2159_s30   ;;  %s1743_s29 = sphi %s1841_s29, %s2158_s29  }
  0x14   : > { %p1179_p0 = scmp.ge.s32.totalorder %s1755_s16, 1  ;;  %p58_p1 = scmp.eq.s32.totalorder %s1865_s20, 0 }
  0x15   : > { %p372_p2 = scmp.lt.s32.totalorder %s1755_s16, 3  ;;  %s1757_s22 = smov [#allocation5]  }
  0x16   : > { %s391_s23 = sshll.u32 %s1757_s22, 4  ;;  %s2141_s5 = sld [smem:[#allocation26_spill]]  ;;  %s392_s23 = int_to_ptr.vmem [resolvable:$true] %s391_s23 }
  0x17   : > { %p1870_p3 = pnand %p1179_p0, %p372_p2  ;;  %s2143_s9 = sld [smem:[#allocation28_spill]] }
  0x18   : > { %s1758_s22 = smov [#allocation8]   ;;  %s1759_s13 = smov 64  }
  0x19   : > { %s389_s19 = sshll.u32 %s2139_s3, 4  ;;  %p1332_p4 = pneg %p1870_p3  ;;  %s390_s19 = int_to_ptr.hbm [resolvable:$true] %s389_s19 }
  0x1a   : > { %s419_s3 = sshll.u32 %s1758_s22, 4  ;;  %s1760_s12 = smov 4   ;;  %s420_s3 = int_to_ptr.vmem [resolvable:$true] %s419_s3 }
  0x1b   : > { %p1882_p6 = pnand %p1332_p4, %p58_p1  ;;  %s2144_s4 = sld [smem:[#allocation25_spill]] }
  0x1c   : > { %s417_s26 = sshll.u32 %s2141_s5, 4  ;;  %s1761_s17 = smov [#allocation11]   ;;  %s418_s26 = int_to_ptr.hbm [resolvable:$true] %s417_s26 }
  0x1d   : > { %s451_s18 = sshll.u32 %s2143_s9, 4  ;;  %s453_s22 = sshll.u32 %s1761_s17, 4  ;;  %s452_s18 = int_to_ptr.hbm [resolvable:$true] %s451_s18  ;;  %s454_s22 = int_to_ptr.vmem [resolvable:$true] %s453_s22 }
  0x1e   : > { %1335 = dma.hbm_to_vmem [thread:$0]  (!%p1882_p6), %s390_s19, 256, %s392_s23, [#allocation6], %s1759_s13, %s1759_s13, %s1760_s12  }
  0x1f   : > { %1341 = dma.hbm_to_vmem [thread:$0]  (!%p1882_p6), %s418_s26, 256, %s420_s3, [#allocation9], %s1759_s13, %s1759_s13, %s1760_s12  }
  0x20   : > { %1347 = dma.hbm_to_vmem [thread:$0]  (!%p1882_p6), %s452_s18, 256, %s454_s22, [#allocation12], %s1759_s13, %s1759_s13, %s1760_s12  }
  0x21   : > { %s403_s28 = sshll.u32 %s2144_s4, 4  ;;  %s1762_s19 = smov [#allocation7]   ;;  %s404_s28 = int_to_ptr.hbm [resolvable:$true] %s403_s28 }
  0x22   : > { %s405_s23 = sshll.u32 %s1762_s19, 4  ;;  %s2145_s6 = sld [smem:[#allocation27_spill]]  ;;  %s406_s23 = int_to_ptr.vmem [resolvable:$true] %s405_s23 }
  0x23   : > { %1338 = dma.hbm_to_vmem [thread:$0]  (!%p1882_p6), %s404_s28, 256, %s406_s23, [#allocation6], %s1759_s13, %s1759_s13, %s1760_s12  }
  0x24   : > { %s2146_s11 = sld [smem:[#allocation29_spill]]  ;;  %s1763_s17 = smov [#allocation10]  }
  0x25   : > { %s433_s5 = sshll.u32 %s1763_s17, 4  ;;  %s1764_s28 = smov [#allocation13]   ;;  %s434_s5 = int_to_ptr.vmem [resolvable:$true] %s433_s5 }
  0x26   : > { %s470_s22 = sshll.u32 %s1764_s28, 4  ;;  %s1178_s19 = sadd.s32 4294967294, %s1755_s16   ;;  %s471_s22 = int_to_ptr.vmem [resolvable:$true] %s470_s22 }
  0x27   : > { %s1930_s23 = sadd.s32 1, %s1755_s16   ;;  %s44_s24 = sadd.s32 1, %s1751_s15 }
  0x28   : > { %s431_s26 = sshll.u32 %s2145_s6, 4  ;;  %s41_s3 = ssub.s32 %s1755_s16, %s1930_s23  ;;  %s432_s26 = int_to_ptr.hbm [resolvable:$true] %s431_s26 }
  0x29   : > { %1344 = dma.hbm_to_vmem [thread:$0]  (!%p1882_p6), %s432_s26, 256, %s434_s5, [#allocation9], %s1759_s13, %s1759_s13, %s1760_s12  }
  0x2a   : > { %s468_s25 = sshll.u32 %s2146_s11, 4  ;;  %p42_p7 = scmp.eq.s32.totalorder %s41_s3, 0  ;;  %s469_s25 = int_to_ptr.hbm [resolvable:$true] %s468_s25 }
  0x2b   : > { %1350 = dma.hbm_to_vmem [thread:$0]  (!%p1882_p6), %s469_s25, 1024, %s471_s22, [#allocation12], %s1759_s13, %s1759_s13, %s1760_s12  }
  0x2c   : > { %p51_p8 = scmp.ne.s32.totalorder %s1751_s15, %s1747_s30  ;;  %p52_p9 = scmp.eq.s32.totalorder %s1755_s16, 0 }
  0x2d   : > { %p57_p10 = scmp.ne.s32.totalorder %s1747_s30, %s1743_s29  ;;  %p333_p13 = scmp.eq.s32.totalorder %s1865_s20, 1 }
  0x2e   : > { %s1941_s26 = scalar_select %p42_p7, %s1751_s15, %s44_s24  }
  0x2f   : > { %p1943_p11 = por %p52_p9, %p51_p8  ;;  %p1949_p12 = por %p58_p1, %p57_p10 }
  0x30   : > { %2147 = sst [smem:[#allocation23_spill]] %s1941_s26  ;;  %p339_p0 = scmp.eq.s32.totalorder %s1178_s19, 1 }
  0x31   : > { %p1368_p2 = scmp.lt.s32.totalorder %s1755_s16, 2  ;;  %s487_s13 = sand.u32 1, %s1751_s15  }
  0x32   : > { %p1956_p4 = por %p333_p13, %p51_p8  ;;  %p1960_p6 = por %p339_p0, %p57_p10 }
  0x33   : > { %s1187_s17 = sshll.u32 %s487_s13, 3  ;;  %s1188_s5 = sshll.u32 %s1755_s16, 3 }
  0x34   : > { %s495_s3 = scalar_lea.hbm %s2114_s0, %s1188_s5  ;;  %s491_s24 = scalar_lea.vmem [#allocation2], %s1187_s17 }
  0x35   : > { %s499_s4 = sshll.u32 %s491_s24, 4  ;;  %s497_s6 = sshll.u32 %s495_s3, 4  ;;  %s500_s4 = int_to_ptr.vmem [resolvable:$true] %s499_s4  ;;  %s498_s6 = int_to_ptr.hbm [resolvable:$true] %s497_s6 }
  0x36   : > { %p1970_p7 = pnand %p1368_p2, %p1943_p11  ;;  %s488_s9 = scalar_lea.sflag [#allocation3], %s487_s13 }
  0x37   : > { %s1615_s11 = sshra.s32 %s498_s6, 4  ;;  %s1622_s28 = scalar_lea.hbm %s2114_s0, 16  ;;  %s1616_s11 = int_to_ptr.hbm [resolvable:$true] %s1615_s11 }
  0x38   : > { %s1617_s26 = scalar_lea.hbm %s1616_s11, 8  ;;  %p1619_p9 = pneg %p1970_p7 }
  0x39   : > { %p1618_p8 = scmp.ne.s32.totalorder %s1616_s11, %s1617_s26  ;;  %p1623_p11 = scmp.lt.s32.totalorder %s1616_s11, %s2114_s0 }
  0x3a   : > { %p1624_p0 = scmp.lt.s32.totalorder %s1622_s28, %s1617_s26 }
  0x3b   : > { %p1620_p10 = pnand %p1619_p9, %p1618_p8 }
  0x3c   : > { %p1625_p2 = por %p1624_p0, %p1623_p11 }
  0x3d   : > { %p1621_p13 = pneg %p1620_p10 }
  0x3f   : > { %p1626_p5 = pnand %p1625_p2, %p1621_p13 }
  0x41   : > { %1629 = shalt.err (!%p1626_p5)
}
  0x42   : > { %1354 = dma.hbm_to_vmem [thread:$0]  (!%p1970_p7), %s498_s6, 128, %s500_s4, %s488_s9  }
  0x43   : > { %508 = sbr.rel (%p1870_p3) target bundleno = 1701 (0x6a5), region = 72  ;;  %s1987_s13 = sand.u32 (!%p1870_p3), 1, %s1747_s30  }
  0x44   : > { %s2130_s3 = sshll.u32 (!%p1870_p3), %s1987_s13, 3  ;;  %s511_s24 = scalar_lea.sflag (!%p1870_p3), [#allocation3], %s1987_s13 }
  0x45   : > { %s514_s11 = scalar_lea.vmem (!%p1870_p3), [#allocation2], %s2130_s3 }
  0x48   : > { %1718 = dma.done.wait (%p1949_p12), %s511_s24, 128  }
  0x49   : > { %1720 = vsyncadd (%p1949_p12), %s511_s24, 4294967168 }
  0x4a   : > { %1722 = dma.done.wait (%p58_p1), [#allocation6], 512  }
  0x4b   : > { %1724 = vsyncadd (%p58_p1), [#allocation6], 4294966784 }
  0x4c   : > { %1726 = dma.done.wait (%p58_p1), [#allocation9], 512  }
  0x4d   : > { %1728 = vsyncadd (%p58_p1), [#allocation9], 4294966784 }
  0x4e   : > { %1730 = dma.done.wait (%p58_p1), [#allocation12], 1280  }
  0x4f   : > { %1732 = vsyncadd (%p58_p1), [#allocation12], 4294966016  ;;  %vm599_vm0 = vcmask 261120   ;;  %v2009_v0 = vld [vmem:[%s514_s11] sm:$0xff]  ;;  %v1765_v2 = vmov 32.0   ;;  %v1285_v14 = vld [vmem:[#allocation5 + $0x8] sm:$0xff] }
  0x50   : > { %v600_v1 = vsel %vm599_vm0, %v2009_v0, 0.0  ;;  %1423 = vrcp.f32 %v1765_v2  ;;  %v1287_v15 = vld [vmem:[#allocation7 + $0x8] sm:$0xff]  ;;  %v1289_v16 = vld [vmem:[#allocation8 + $0x8] sm:$0xff]  ;;  %663 = vmatpush.bf16.msra.mxu0 %v1285_v14  ;;  %v1284_v17 = vld [vmem:[#allocation5] sm:$0xff]  ;;  %vm767_vm5 = vcmask 1043456   ;;  %vm751_vm6 = vcmask 64512  }
  0x51   : > { %601 = vadd.xlane.f32.xlu0 %v600_v1  ;;  %693 = vmatpush.bf16.msra.mxu1 %v1287_v15  ;;  %v1286_v18 = vld [vmem:[#allocation7] sm:$0xff]  ;;  %v1288_v19 = vld [vmem:[#allocation8] sm:$0xff]  ;;  %v1291_v56 = vld [vmem:[#allocation10 + $0x8] sm:$0xff]  ;;  %s1198_s26 = sshll.u32 %s1987_s13, 2  ;;  %s1281_s24 = sshll.u32 %s1865_s20, 2 }
  0x52   : > { %723 = vmatpush.bf16.msra.mxu2 %v1289_v16  ;;  %v1417_v29 = vld [vmem:[%s2115_s1] ss:$0 sm:$0xff]  ;;  %s2035_s12 = scalar_lea.vmem [#allocation15], %s1198_s26  ;;  %v1293_v14 = vld [vmem:[#allocation11 + $0x8] sm:$0xff]  ;;  %v1292_v15 = vld [vmem:[#allocation11] sm:$0xff]  ;;  %s1013_s6 = scalar_lea.hbm %s2128_s14, %s1281_s24 }
  0x53   : > { %v1418_v32 = vld [vmem:[%s2116_s2] ss:$0 sm:$0xff]  ;;  %s1015_s9 = sshll.u32 %s2035_s12, 4  ;;  %s1017_s21 = sshll.u32 %s1013_s6, 4  ;;  %s1016_s9 = int_to_ptr.vmem [resolvable:$true] %s1015_s9  ;;  %s1018_s21 = int_to_ptr.hbm [resolvable:$true] %s1017_s21 }
  0x54   : > { %664 = vmatpush.bf16.msra.mxu0 %v1284_v17  ;;  %v1290_v57 = vld [vmem:[#allocation10] sm:$0xff]  ;;  %s989_s26 = scalar_lea.sflag [#allocation16], %s1987_s13  ;;  %s1659_s19 = sshra.s32 %s1018_s21, 4  ;;  %s1660_s19 = int_to_ptr.hbm [resolvable:$true] %s1659_s19 }
  0x55   : > { %694 = vmatpush.bf16.msra.mxu1 %v1286_v18  ;;  %s1661_s17 = scalar_lea.hbm %s1660_s19, 4  ;;  %s1665_s22 = scalar_lea.hbm %s2128_s14, 8 }
  0x56   : > { %v1424_v3 = vpop.eup %1423  ;;  %724 = vmatpush.bf16.msra.mxu2 %v1288_v19  ;;  %p1662_p1 = scmp.ne.s32.totalorder %s1660_s19, %s1661_s17  ;;  %p1666_p12 = scmp.lt.s32.totalorder %s1660_s19, %s2128_s14 }
  0x57   : > { %v604_v4 = vmul.f32 32.0, %v1424_v3  ;;  %vm608_vm1 = vweird.f32 %v1424_v3  ;;  %p1667_p7 = scmp.lt.s32.totalorder %s1665_s22, %s1661_s17 }
  0x58   : > { %p1663_p3 = pnand %p1662_p1, %p1956_p4 }
  0x59   : > { %v605_v5 = vsub.f32 1.0, %v604_v4  ;;  %810 = vmatpush.bf16.msrb.mxu1 %v1291_v56  ;;  %p1668_p8 = por %p1667_p7, %p1666_p12 }
  0x5a   : > { %880 = vmatpush.bf16.msrb.mxu2 %v1293_v14  ;;  %p1664_p5 = pneg %p1663_p3 }
  0x5b   : > { %v606_v6 = vmul.f32 %v1424_v3, %v605_v5 }
  0x5c   : > { %p1669_p9 = pnand %p1668_p8, %p1664_p5 }
  0x5d   : > { %v607_v7 = vadd.f32 %v1424_v3, %v606_v6  ;;  %811 = vmatpush.bf16.msrb.mxu1 %v1290_v57 }
  0x5e   : > { %881 = vmatpush.bf16.msrb.mxu2 %v1292_v15 }
  0x5f   : > { %v2013_v8 = vsel %vm608_vm1, %v1424_v3, %v607_v7 }
  0xc4   : > { %v602_v9 = vpop.xlane.xlu0 %601 }
  0xc5   : > { %v610_v10 = vmul.f32 %v2013_v8, %v602_v9 }
  0xc7   : > { %v611_v11 = vsub.f32 %v2009_v0, %v610_v10 }
  0xc9   : > { %v612_v12 = vmul.f32 %v611_v11, %v611_v11 }
  0xcb   : > { %v613_v13 = vsel %vm599_vm0, %v612_v12, 0.0 }
  0xcc   : > { %614 = vadd.xlane.f32.xlu0 %v613_v13 }
 0x13f   : > { %v615_v20 = vpop.xlane.xlu0 %614 }
 0x140   : > { %v616_v21 = vmul.f32 %v615_v20, %v2013_v8 }
 0x142   : > { %v617_v22 = vadd.f32 1e-05, %v616_v21 }
 0x144   : > { %1425 = vrsqrt.f32 %v617_v22  ;;  %vm624_vm3 = vweird.f32 %v617_v22 }
 0x14a   : > { %v1426_v23 = vpop.eup %1425 }
 0x14b   : > { %v619_v24 = vmul.f32 %v1426_v23, %v617_v22  ;;  %vm625_vm2 = vweird.f32 %v1426_v23 }
 0x14c   : > { %vm626_vm4 = vmor %vm624_vm3, %vm625_vm2 }
 0x14d   : > { %v620_v25 = vmul.f32 %v1426_v23, %v619_v24 }
 0x14f   : > { %v621_v26 = vmul.f32 0.5, %v620_v25  ;;  %v1419_v25 = vld [vmem:[%s2121_s7] ss:$0 sm:$0xff] }
 0x151   : > { %v622_v27 = vsub.f32 1.5, %v621_v26 }
 0x153   : > { %v623_v28 = vmul.f32 %v1426_v23, %v622_v27 }
 0x155   : > { %v627_v30 = vsel %vm626_vm4, %v1426_v23, %v623_v28 }
 0x156   : > { %v628_v31 = vmul.f32 %v627_v30, %v611_v11 }
 0x158   : > { %v632_v33 = vmul.f32 %v1417_v29, %v628_v31  ;;  %v1300_v31 = vld [vmem:[#allocation13 + $0x30] sm:$0xff] }
 0x15a   : > { %v636_v34 = vadd.f32 %v1418_v32, %v632_v33  ;;  %v1299_v32 = vld [vmem:[#allocation13 + $0x28] sm:$0xff]  ;;  %v1298_v33 = vld [vmem:[#allocation13 + $0x20] sm:$0xff] }
 0x15c   : > { %v637_v35 = vpack.c.bf16 %v636_v34, %v636_v34  ;;  %v1297_v34 = vld [vmem:[#allocation13 + $0x18] sm:$0xff] }
 0x15e   : > { %1207 = vmatmul.msk.bf16.vlgmr.msra.gmra.mxu0 %vm599_vm0, %v637_v35  ;;  %1216 = vmatmul.msk.bf16.vlgmr.msra.gmra.mxu1 %vm599_vm0, %v637_v35 }
 0x15f   : > { %1225 = vmatmul.msk.bf16.vlgmr.msra.gmra.mxu2 %vm599_vm0, %v637_v35  ;;  %v1296_v35 = vld [vmem:[#allocation13 + $0x10] sm:$0xff] }
 0x1db   : > { %v666_v36 = vpop.f32.mrf.mxu0  ;;  %v696_v37 = vpop.f32.mrf.mxu1 }
 0x1dc   : > { %v700_v38 = vpack.c.bf16 %v696_v37, %v696_v37  ;;  %v670_v44 = vpack.c.bf16 %v666_v36, %v666_v36  ;;  %v1295_v36 = vld [vmem:[#allocation13 + $0x8] sm:$0xff]  ;;  %v1294_v37 = vld [vmem:[#allocation13] sm:$0xff] }
 0x1de   : > { %v735_v39 = vsel %vm599_vm0, %v700_v38, 0  ;;  %v1421_v38 = vld [vmem:[%s2124_s10] ss:$0 sm:$0xff] }
 0x1df   : > { %744 = vmatpush.bf16.xpose.msra.mxu3 %v735_v39 }
 0x1e2   : > { %v726_v40 = vpop.f32.mrf.mxu2 }
 0x1e3   : > { %v730_v41 = vpack.c.bf16 %v726_v40, %v726_v40  ;;  %v668_v42 = vpop.f32.mrf.mxu0  ;;  %v698_v43 = vpop.f32.mrf.mxu1 }
 0x1e5   : > { %v769_v45 = vsel %vm767_vm5, %v730_v41, 0 }
 0x1e6   : > { %778 = vmatpush.bf16.msrb.mxu0 %v769_v45  ;;  %1226 = vmatmul.msk.bf16.vlgmr.msra.gmra.mxu3 %vm599_vm0, %v670_v44 }
 0x1ea   : > { %v728_v46 = vpop.f32.mrf.mxu2 }
 0x269   : > { %v746_v47 = vpop.f32.mrf.mxu3 }
 0x26a   : > { %v750_v48 = vmul.f32 0.17677669, %v746_v47 }
 0x26c   : > { %v752_v49 = vsel %vm751_vm6, %v750_v48, -inf }
 0x26d   : > { %753 = vmax.xlane.f32.xlu1 %v752_v49 }
 0x271   : > { %v748_v50 = vpop.f32.mrf.mxu3 }
 0x2e0   : > { %v754_v51 = vpop.xlane.xlu1 %753 }
 0x2e1   : > { %v755_v52 = vsub.f32 %v750_v48, %v754_v51 }
 0x2e3   : > { %v756_v53 = vmul.f32 1.442695, %v755_v52 }
 0x2e5   : > { %1427 = vpow2.f32 %v756_v53 }
 0x2eb   : > { %v1428_v54 = vpop.eup %1427 }
 0x2ec   : > { %v758_v55 = vsel %vm751_vm6, %v1428_v54, 0.0 }
 0x2ed   : > { %759 = vadd.xlane.f32.xlu1 %v758_v55 }
 0x360   : > { %v760_v58 = vpop.xlane.xlu1 %759 }
 0x361   : > { %1429 = vrcp.f32 %v760_v58 }
 0x367   : > { %v1430_v59 = vpop.eup %1429 }
 0x368   : > { %v762_v60 = vmul.f32 %v1430_v59, %v1428_v54 }
 0x36a   : > { %v980_v61 = vsel %vm751_vm6, %v762_v60, 0.0  ;;  %v763_v62 = vpack.c.bf16 %v762_v60, %v762_v60 }
 0x36b   : > { %v981_v63 = vpack.c.bf16 %v980_v61, %v980_v61 }
 0x36c   : > { %1227 = vmatmul.msk.bf16.vlgmr.msrb.gmra.mxu0 %vm751_vm6, %v763_v62 }
 0x36d   : > { %982 = vst [vmem:[%s2035_s12] sm:$0xf] %v981_v63 }
 0x3e9   : > { %v780_v1 = vpop.f32.mrf.mxu0 }
 0x3ea   : > { %v784_v2 = vpack.c.bf16 %v780_v1, %v780_v1 }
 0x3ec   : > { %1236 = vmatmul.msk.bf16.vlgmr.msrb.gmra.mxu1 %vm599_vm0, %v784_v2 }
 0x3f1   : > { %v782_v3 = vpop.f32.mrf.mxu0 }
 0x469   : > { %v813_v4 = vpop.f32.mrf.mxu1 }
 0x46a   : > { %v2040_v5 = vadd.f32 %v813_v4, %v2009_v0  ;;  %v1301_v0 = vld [vmem:[#allocation13 + $0x38] sm:$0xff] }
 0x46b   : > { %965 = vmatpush.bf16.msrb.mxu3 %v1301_v0 }
 0x46c   : > { %v820_v6 = vsel %vm599_vm0, %v2040_v5, 0.0 }
 0x46d   : > { %821 = vadd.xlane.f32.xlu2 %v820_v6 }
 0x46f   : > { %966 = vmatpush.bf16.msrb.mxu3 %v1300_v31 }
 0x471   : > { %v815_v7 = vpop.f32.mrf.mxu1 }
 0x473   : > { %967 = vmatpush.bf16.msrb.mxu3 %v1299_v32 }
 0x477   : > { %968 = vmatpush.bf16.msrb.mxu3 %v1298_v33 }
 0x47b   : > { %969 = vmatpush.bf16.msrb.mxu3 %v1297_v34 }
 0x47f   : > { %970 = vmatpush.bf16.msrb.mxu3 %v1296_v35 }
 0x483   : > { %971 = vmatpush.bf16.msrb.mxu3 %v1295_v36 }
 0x487   : > { %972 = vmatpush.bf16.msrb.mxu3 %v1294_v37 }
 0x4e0   : > { %v822_v9 = vpop.xlane.xlu2 %821 }
 0x4e1   : > { %v823_v10 = vmul.f32 %v822_v9, %v2013_v8 }
 0x4e3   : > { %v824_v11 = vsub.f32 %v2040_v5, %v823_v10 }
 0x4e5   : > { %v825_v12 = vmul.f32 %v824_v11, %v824_v11 }
 0x4e7   : > { %v826_v13 = vsel %vm599_vm0, %v825_v12, 0.0 }
 0x4e8   : > { %827 = vadd.xlane.f32.xlu2 %v826_v13 }
 0x55b   : > { %v828_v16 = vpop.xlane.xlu2 %827 }
 0x55c   : > { %v829_v17 = vmul.f32 %v828_v16, %v2013_v8  ;;  %v1420_v8 = vld [vmem:[%s2122_s8] ss:$0 sm:$0xff] }
 0x55e   : > { %v830_v18 = vadd.f32 1e-05, %v829_v17 }
 0x560   : > { %1431 = vrsqrt.f32 %v830_v18  ;;  %vm837_vm8 = vweird.f32 %v830_v18 }
 0x566   : > { %v1432_v19 = vpop.eup %1431 }
 0x567   : > { %v832_v20 = vmul.f32 %v1432_v19, %v830_v18  ;;  %vm838_vm7 = vweird.f32 %v1432_v19 }
 0x568   : > { %vm839_vm9 = vmor %vm837_vm8, %vm838_vm7 }
 0x569   : > { %v833_v21 = vmul.f32 %v1432_v19, %v832_v20 }
 0x56b   : > { %v834_v22 = vmul.f32 0.5, %v833_v21 }
 0x56d   : > { %v835_v23 = vsub.f32 1.5, %v834_v22 }
 0x56f   : > { %v836_v24 = vmul.f32 %v1432_v19, %v835_v23 }
 0x571   : > { %v840_v26 = vsel %vm839_vm9, %v1432_v19, %v836_v24 }
 0x572   : > { %v841_v27 = vmul.f32 %v840_v26, %v824_v11 }
 0x574   : > { %v845_v28 = vmul.f32 %v1419_v25, %v841_v27 }
 0x576   : > { %v849_v29 = vadd.f32 %v1420_v8, %v845_v28 }
 0x578   : > { %v850_v30 = vpack.c.bf16 %v849_v29, %v849_v29 }
 0x57a   : > { %1245 = vmatmul.msk.bf16.vlgmr.msrb.gmra.mxu2 %vm599_vm0, %v850_v30 }
 0x5fd   : > { %v883_v39 = vpop.f32.mrf.mxu2 }
 0x5fe   : > { %v884_v40 = vadd.f32 %v1421_v38, %v883_v39 }
 0x600   : > { %v887_v41 = vmul.f32 %v884_v40, %v884_v40 }
 0x602   : > { %v888_v42 = vmul.f32 %v887_v41, %v884_v40 }
 0x604   : > { %v889_v43 = vmul.f32 0.044715, %v888_v42 }
 0x605   : > { %v885_v44 = vpop.f32.mrf.mxu2 }
 0x606   : > { %v890_v45 = vadd.f32 %v889_v43, %v884_v40 }
 0x608   : > { %v891_v46 = vmul.f32 0.7978846, %v890_v45 }
 0x60a   : > { %1433 = vtanh.f32 %v891_v46 }
 0x610   : > { %v1434_v47 = vpop.eup %1433 }
 0x611   : > { %v893_v48 = vadd.f32 1.0, %v1434_v47 }
 0x613   : > { %v894_v49 = vmul.f32 0.5, %v893_v48 }
 0x615   : > { %v895_v50 = vmul.f32 %v894_v49, %v884_v40 }
 0x617   : > { %v896_v51 = vpack.c.bf16 %v895_v50, %v895_v50 }
 0x619   : > { %973 = vmatmul.bf16.vlgmr.msrb.gmra.mxu3 %v896_v51 }
 0x61a   : > { %1672 = shalt.err (!%p1669_p9)
}
 0x61b   : > { %1329 = dma.vmem_to_hbm [thread:$0]  (%p1956_p4), %s1016_s9, 64, %s1018_s21, %s989_s26  }
 0x61c   : > { %s1280_s12 = sshll.u32 %s1865_s20, 3  ;;  %s2153_s4 = sld [smem:[#allocation30_spill]] }
 0x61d   : > { %s2154_s28 = sld [smem:[#allocation31_spill]]  ;;  %s2155_s19 = sshll.u32 %s1987_s13, 3 }
 0x61e   : > { %s587_s17 = scalar_lea.vmem [#allocation14], %s2155_s19  ;;  %s984_s20 = scalar_lea.sflag [#allocation4], %s1987_s13 }
 0x61f   : > { %s1001_s22 = sshll.u32 %s587_s17, 4  ;;  %s1002_s22 = int_to_ptr.vmem [resolvable:$true] %s1001_s22 }
 0x622   : > { %v1422_v52 = vld [vmem:[%s2153_s4] ss:$0 sm:$0xff] }
 0x623   : > { %s999_s3 = scalar_lea.hbm %s2154_s28, %s1280_s12  ;;  %s1693_s24 = scalar_lea.hbm %s2154_s28, 16 }
 0x624   : > { %s1003_s27 = sshll.u32 %s999_s3, 4  ;;  %s1004_s27 = int_to_ptr.hbm [resolvable:$true] %s1003_s27 }
 0x625   : > { %s1687_s9 = sshra.s32 %s1004_s27, 4  ;;  %s1688_s9 = int_to_ptr.hbm [resolvable:$true] %s1687_s9 }
 0x626   : > { %s1689_s21 = scalar_lea.hbm %s1688_s9, 8  ;;  %p1694_p0 = scmp.lt.s32.totalorder %s1688_s9, %s2154_s28 }
 0x627   : > { %p1690_p10 = scmp.ne.s32.totalorder %s1688_s9, %s1689_s21  ;;  %p1695_p2 = scmp.lt.s32.totalorder %s1693_s24, %s1689_s21 }
 0x629   : > { %p1691_p13 = pnand %p1690_p10, %p1956_p4  ;;  %p1696_p1 = por %p1695_p2, %p1694_p0 }
 0x62b   : > { %p1692_p11 = pneg %p1691_p13 }
 0x62d   : > { %p1697_p3 = pnand %p1696_p1, %p1692_p11 }
 0x69c   : > { %v974_v53 = vpop.f32.mrf.mxu3 }
 0x69d   : > { %v975_v54 = vadd.f32 %v1422_v52, %v974_v53 }
 0x69f   : > { %v978_v55 = vadd.f32 %v975_v54, %v2040_v5 }
 0x6a1   : > { %979 = vst.msk [vmem:[%s587_s17] sm:$0xff] %vm599_vm0, %v978_v55 }
 0x6a2   : > { %1700 = shalt.err (!%p1697_p3)
}
 0x6a3   : > { %1328 = dma.vmem_to_hbm [thread:$0]  (%p1956_p4), %s1002_s22, 128, %s1004_s27, %s984_s20  }
 0x6a4   : > { %v976_v56 = vpop.f32.mrf.mxu3 }
 0x6a5 PF: > { %s1029_s13 = sand.u32 1, %s1743_s29   ;;  %p2156_p5 = scmp.ge.s32.totalorder %s1755_s16, 2 }
 0x6a6   : > { %s1030_s6 = scalar_lea.sflag [#allocation4], %s1029_s13 }
 0x6a7   : > { %p1356_p12 = pnand %p2156_p5, %p1960_p6 }
 0x6a9   : > { %p1357_p7 = pneg %p1356_p12 }
 0x6ab   : > { %1734 = dma.done.wait (%p1357_p7), %s1030_s6, 128  }
 0x6ac   : > { %1736 = vsyncadd (%p1357_p7), %s1030_s6, 4294967168  ;;  %s1040_s5 = scalar_lea.sflag [#allocation16], %s1029_s13 }
 0x6ad   : > { %1738 = dma.done.wait (%p1357_p7), %s1040_s5, 64  }
 0x6ae   : > { %1740 = vsyncadd (%p1357_p7), %s1040_s5, 4294967232  ;;  %s2157_s18 = sld [smem:[#allocation23_spill]]  ;;  %p34_p4 = scmp.ge.s32.totalorder %s1930_s23, 4  }
 0x6af   : > { %s2158_s29 = smov %s1747_s30  ;;  %s2159_s30 = smov %s1751_s15 }
 0x6b0   : > { %s2161_s16 = smov %s1930_s23  ;;  %36 = sbr.rel (!%p34_p4) target bundleno = 19 (0x13), region = 158 }
 0x6b4   : > { %s2160_s15 = smov %s2157_s18 }
 0x6b5   :  { %1046 = vsyncpa [#allocation3], 1 }
 0x6b6   :  { %1048 = vsyncpa [#allocation3 + $0x1], 1 }
 0x6b7   :  { %1049 = vsyncpa [#allocation6], 1 }
 0x6b8   :  { %1050 = vsyncpa [#allocation9], 1 }
 0x6b9   :  { %1051 = vsyncpa [#allocation12], 1 }
 0x6ba   :  { %1052 = vsyncpa [#allocation4], 1 }
 0x6bb   :  { %1054 = vsyncpa [#allocation4 + $0x1], 1 }
 0x6bc   :  { %1055 = vsyncpa [#allocation16], 1 }
 0x6bd   :  { %1057 = vsyncpa [#allocation16 + $0x1], 1 }

</bundles_post_ra>
